<compile_context>
chip_gen: v7x
topology: tpu7x:2x2x1
jax: 0.10.0
libtpu: 0.0.40
codegen_flags: <defaults>
</compile_context>

<pallas_src>
import jax
import jax.numpy as jnp
from jax.experimental import pallas as pl
from jax.experimental.pallas import tpu as pltpu


def _round_up(x, m):
    return ((x + m - 1) // m) * m


def _vmem_capacity_bytes():
    try:
        return int(pltpu.get_tpu_info().vmem_capacity_bytes)
    except Exception:
        return 64 << 20          # most conservative default (v7x per-TensorCore VMEM)


# ------------------------------------------------------------------------------ kernel
def _make_kernel(has_cond, cout_pad):
    P = cout_pad

    def kernel(*refs):
        if has_cond:
            x_ref, c_ref, wbig_ref, wc_ref, ball_ref, w2_ref, out_ref = refs
        else:
            x_ref, wbig_ref, ball_ref, w2_ref, out_ref = refs

        wdt = wbig_ref.dtype

        # One wide matmul covering [Linear1_val | Linear1_gate | skip] on x.
        # The astype is a VPU cast hidden under the MXU — x stays f32 in HBM/VMEM.
        h_all = jnp.dot(x_ref[...].astype(wdt), wbig_ref[...],
                        preferred_element_type=jnp.float32)
        h_all = h_all + ball_ref[...]                # [b1_val | b1_gate | b_skip], f32

        val = h_all[:, :P]                           # 128-aligned lane slices — free
        gate = h_all[:, P:2 * P]
        skip = h_all[:, 2 * P:]

        if has_cond:
            hc = jnp.dot(c_ref[...].astype(wdt), wc_ref[...],
                         preferred_element_type=jnp.float32)
            val = val + hc[:, :P]
            gate = gate + hc[:, P:]

        # AttentionFunction (GLU-style gate): val * sigmoid(gate).
        # exp and the approximate reciprocal both use the EUP slot (free vs. VALU).
        gated = val * pl.reciprocal(1.0 + jnp.exp(-gate), approx=True)

        # Linear2 (no bias): MXU in the weight dtype, f32 accumulation.
        y = jnp.dot(gated.astype(w2_ref.dtype), w2_ref[...],
                    preferred_element_type=jnp.float32)

        out_ref[...] = (y + skip).astype(out_ref.dtype)

    return kernel


# ------------------------------------------------------------------------------ wrapper
def conditioned_resnet_block(x, cond, prepared, *, tile_b=None,
                             out_dtype=jnp.float32, return_padded=False):
    """x: [B, Cin] f32, cond: [B, Ccond] f32 or None, prepared: see prepare_params."""
    w = prepared["weights"]
    cout = prepared["out_channels"]
    P = prepared["cout_pad"]
    has_cond = cond is not None and prepared["in_channels_cond"] > 0

    B, cin = x.shape
    ccond = cond.shape[1] if has_cond else 0

    # ---- batch tiling ---------------------------------------------------------
    if tile_b is None:
        MXU_M = 256                      # v6e/v7x MXU M dim; a multiple of v5e's 128 too
        b_pad = _round_up(B, 8)
        if b_pad <= MXU_M:
            tile_b = b_pad               # single small block
        else:
            # Big MXU-M-aligned tiles, <=1024 rows, and >=2 grid steps so the
            # "parallel" batch axis can shard across both v7x TensorCores.
            tile_b = min(1024, _round_up(pl.cdiv(b_pad, 2), MXU_M), b_pad)
    grid = (pl.cdiv(B, tile_b),)

    def act_spec(feat):
        return pl.BlockSpec((tile_b, feat), lambda i: (i, 0))

    def full_spec(arr):                  # grid-invariant: stays VMEM-resident
        return pl.BlockSpec(arr.shape, lambda i: (0, 0))

    if has_cond:
        args = [x, cond, w["wbig"], w["wcond"], w["ball"], w["w2"]]
        in_specs = [act_spec(cin), act_spec(ccond),
                    full_spec(w["wbig"]), full_spec(w["wcond"]),
                    full_spec(w["ball"]), full_spec(w["w2"])]
    else:
        args = [x, w["wbig"], w["ball"], w["w2"]]
        in_specs = [act_spec(cin),
                    full_spec(w["wbig"]), full_spec(w["ball"]), full_spec(w["w2"])]

    # ---- scheduler hints (merged-matmul accounting) ---------------------------
    flops = 2 * B * (cin * 3 * P + ccond * 2 * P + P * P)
    transcendentals = 2 * B * P                              # exp + approx reciprocal
    weight_bytes = int(sum(a.size * a.dtype.itemsize for a in w.values()))
    out_itemsize = jnp.dtype(out_dtype).itemsize
    bytes_accessed = int(B * (cin + ccond) * x.dtype.itemsize   # activations (f32 in)
                         + weight_bytes                          # weights, once (resident)
                         + B * P * out_itemsize)                 # output

    # ---- VMEM budget: default pipeline double-buffers everything, incl. weights.
    act_tile_bytes = tile_b * (cin + ccond) * 4 + tile_b * P * out_itemsize
    h_bytes = tile_b * 3 * P * 4 * 2                         # h_all + gated/temporaries
    need = 2 * weight_bytes + 2 * act_tile_bytes + h_bytes + (2 << 20)
    vmem_limit = int(min(max(need, 4 << 20), int(0.85 * _vmem_capacity_bytes())))

    out = pl.pallas_call(
        _make_kernel(has_cond, P),
        out_shape=jax.ShapeDtypeStruct((B, P), out_dtype),
        grid=grid,
        in_specs=in_specs,
        out_specs=pl.BlockSpec((tile_b, P), lambda i: (i, 0)),
        compiler_params=pltpu.CompilerParams(
            dimension_semantics=("parallel",),
            vmem_limit_bytes=vmem_limit,
        ),
        cost_estimate=pl.CostEstimate(
            flops=flops,
            transcendentals=transcendentals,
            bytes_accessed=bytes_accessed,
        ),
    )(*args)

    # No-op when Cout is already a multiple of 128 or when the consumer takes the
    # padded slab (return_padded=True) — avoids an extra XLA copy pass.
    return out if return_padded else out[:, :cout]


# ------------------------------------------------------------------------------ params
def init_raw_params(key, in_channels, out_channels, in_channels_cond):
    """Synthetic init with PyTorch nn.Linear layout/semantics (stored as x @ W)."""
    cin_tot = in_channels + in_channels_cond
    k1, k2, k3, k4, k5 = jax.random.split(key, 5)
    s1 = 1.0 / jnp.sqrt(cin_tot)
    s2 = 1.0 / jnp.sqrt(out_channels)
    s3 = 1.0 / jnp.sqrt(in_channels)
    return {
        "w1": jax.random.uniform(k1, (cin_tot, 2 * out_channels), jnp.float32, -s1, s1),
        "b1": jax.random.uniform(k2, (2 * out_channels,), jnp.float32, -s1, s1),
        "w2": jax.random.uniform(k3, (out_channels, out_channels), jnp.float32, -s2, s2),
        "wsk": jax.random.uniform(k4, (in_channels, out_channels), jnp.float32, -s3, s3),
        "bsk": jax.random.uniform(k5, (out_channels,), jnp.float32, -s3, s3),
    }


def prepare_params(raw, in_channels, out_channels, in_channels_cond,
                   compute_dtype=jnp.bfloat16):
    """One-time re-layout.

    * Cout padded to a multiple of 128 (zero columns) -> dense 128-lane stores,
      full MXU result tiles; padded output lanes are exactly 0 and sliced off.
    * x rows of Linear1 merged with the skip weight into W_big = [val|gate|skip]
      (Cin, 3*Cout_pad); cond rows keep [val|gate] (Ccond, 2*Cout_pad).
    * All biases folded into one (1, 3*Cout_pad) f32 vector.
    * compute_dtype (default bf16) applies only to MXU inputs; accumulation and
      all elementwise math remain f32. Note: with bf16, x/cond feed both Linear1
      and the skip path in bf16.
    """
    P = max(_round_up(out_channels, 128), 128)
    cin, ccond, cout = in_channels, in_channels_cond, out_channels

    def pad_cols(a):
        return jnp.pad(a, ((0, 0), (0, P - a.shape[1])))

    w1_val = pad_cols(raw["w1"][:, :cout])                 # (cin+ccond, P)
    w1_gate = pad_cols(raw["w1"][:, cout:])                # (cin+ccond, P)
    wsk = pad_cols(raw["wsk"])                             # (cin, P)

    wbig_x = jnp.concatenate([w1_val[:cin], w1_gate[:cin], wsk], axis=1)   # (cin, 3P)
    b_all = jnp.concatenate([
        jnp.pad(raw["b1"][:cout], (0, P - cout)),
        jnp.pad(raw["b1"][cout:], (0, P - cout)),
        jnp.pad(raw["bsk"], (0, P - cout)),
    ]).reshape(1, 3 * P)
    w2 = jnp.pad(raw["w2"], ((0, P - cout), (0, P - cout)))

    weights = {
        "wbig": wbig_x.astype(compute_dtype),
        "ball": b_all.astype(jnp.float32),      # biases stay f32 (f32 elementwise path)
        "w2": w2.astype(compute_dtype),
    }
    if ccond > 0:
        weights["wcond"] = jnp.concatenate(
            [w1_val[cin:], w1_gate[cin:]], axis=1).astype(compute_dtype)   # (ccond, 2P)

    return {
        "weights": weights,
        "out_channels": cout,
        "cout_pad": P,
        "in_channels_cond": ccond,
        "compute_dtype": compute_dtype,
    }


# ------------------------------------------------------------------------------ reference
def _reference(x, cond, raw, cout):
    xc = jnp.concatenate([x, cond], axis=1) if cond is not None else x
    h = xc @ raw["w1"] + raw["b1"]
    val, gate = h[:, :cout], h[:, cout:]
    y = (val * jax.nn.sigmoid(gate)) @ raw["w2"]
    return y + (x @ raw["wsk"] + raw["bsk"])


if __name__ == "__main__":
    B, Cin, Ccond, Cout = 24, 32, 16, 64
    key = jax.random.PRNGKey(0)
    kx, kc, kp, kp2 = jax.random.split(key, 4)

    x = jax.random.normal(kx, (B, Cin), jnp.float32)
    cond = jax.random.normal(kc, (B, Ccond), jnp.float32)
    raw = init_raw_params(kp, Cin, Cout, Ccond)
    ref = _reference(x, cond, raw, Cout)

    # f32 MXU path (tight-ish check; tolerance accounts for the approx EUP reciprocal
    # in the gate), single grid step.
    prep_f32 = prepare_params(raw, Cin, Cout, Ccond, compute_dtype=jnp.float32)
    out = jax.block_until_ready(conditioned_resnet_block(x, cond, prep_f32))
    assert out.shape == (B, Cout)
    assert jnp.allclose(out, ref, atol=2e-2, rtol=1e-2), \
        float(jnp.max(jnp.abs(out - ref)))

    # Same params, explicit small tile -> multi-step "parallel" grid (exercises tiling).
    out2 = jax.block_until_ready(conditioned_resnet_block(x, cond, prep_f32, tile_b=8))
    assert jnp.allclose(out2, ref, atol=2e-2, rtol=1e-2)

    # Default bf16 MXU path (v5e/v6e/v7x recommended) — looser tolerance.
    prep_bf16 = prepare_params(raw, Cin, Cout, Ccond)
    out3 = jax.block_until_ready(conditioned_resnet_block(x, cond, prep_bf16))
    assert jnp.allclose(out3, ref, atol=1e-1, rtol=1e-1)

    # No-cond variant (in_channels_cond = 0).
    raw_nc = init_raw_params(kp2, Cin, Cout, 0)
    ref_nc = _reference(x, None, raw_nc, Cout)
    prep_nc = prepare_params(raw_nc, Cin, Cout, 0, compute_dtype=jnp.float32)
    out4 = jax.block_until_ready(conditioned_resnet_block(x, None, prep_nc))
    assert jnp.allclose(out4, ref_nc, atol=2e-2, rtol=1e-2)

    print("KERNEL_OK")
</pallas_src>

<mosaic_0001>
module attributes {stable_mosaic.version = 11 : i64} {
  func.func @kernel(%arg0: i32, %arg1: memref<24x32xf32, #tpu.memory_space<vmem>>, %arg2: memref<24x16xf32, #tpu.memory_space<vmem>>, %arg3: memref<32x384xf32, #tpu.memory_space<vmem>>, %arg4: memref<16x256xf32, #tpu.memory_space<vmem>>, %arg5: memref<1x384xf32, #tpu.memory_space<vmem>>, %arg6: memref<128x128xf32, #tpu.memory_space<vmem>>, %arg7: memref<24x128xf32, #tpu.memory_space<vmem>>) attributes {dimension_semantics = [#tpu.dimension_semantics<parallel>], iteration_bounds = array<i64: 1>, scalar_prefetch = 0 : i64, scratch_operands = 0 : i64, tpu.core_type = #tpu.core_type<tc>, window_params = [{transform_indices = @transform_0, window_bounds = array<i64: 24, 32>}, {transform_indices = @transform_1, window_bounds = array<i64: 24, 16>}, {pipeline_mode = #tpu.pipeline_mode<synchronous>, transform_indices = @transform_2, window_bounds = array<i64: 32, 384>}, {pipeline_mode = #tpu.pipeline_mode<synchronous>, transform_indices = @transform_3, window_bounds = array<i64: 16, 256>}, {pipeline_mode = #tpu.pipeline_mode<synchronous>, transform_indices = @transform_4, window_bounds = array<i64: 1, 384>}, {pipeline_mode = #tpu.pipeline_mode<synchronous>, transform_indices = @transform_5, window_bounds = array<i64: 128, 128>}, {transform_indices = @transform_6, window_bounds = array<i64: 24, 128>}]} {
    %c0 = arith.constant 0 : index
    %c0_0 = arith.constant 0 : index
    %0 = vector.load %arg1[%c0, %c0_0] : memref<24x32xf32, #tpu.memory_space<vmem>>, vector<24x32xf32>
    %c0_1 = arith.constant 0 : index
    %c0_2 = arith.constant 0 : index
    %1 = vector.load %arg3[%c0_1, %c0_2] : memref<32x384xf32, #tpu.memory_space<vmem>>, vector<32x384xf32>
    %cst = arith.constant dense<0.000000e+00> : vector<24x384xf32>
    %2 = tpu.matmul %0, %1, %cst {dimension_numbers = #tpu.dot_dimension_numbers<[1], [0], [0], [1], [0, 0, 1, 1], [], []>} : vector<24x32xf32>, vector<32x384xf32>, vector<24x384xf32> -> vector<24x384xf32>
    %c0_3 = arith.constant 0 : index
    %c0_4 = arith.constant 0 : index
    %3 = vector.load %arg5[%c0_3, %c0_4] : memref<1x384xf32, #tpu.memory_space<vmem>>, vector<1x384xf32>
    %4 = vector.broadcast %3 : vector<1x384xf32> to vector<24x384xf32>
    %5 = arith.addf %2, %4 : vector<24x384xf32>
    %6 = vector.extract_strided_slice %5 {offsets = [0, 0], sizes = [24, 128], strides = [1, 1]} : vector<24x384xf32> to vector<24x128xf32>
    %7 = vector.extract_strided_slice %5 {offsets = [0, 128], sizes = [24, 128], strides = [1, 1]} : vector<24x384xf32> to vector<24x128xf32>
    %8 = vector.extract_strided_slice %5 {offsets = [0, 256], sizes = [24, 128], strides = [1, 1]} : vector<24x384xf32> to vector<24x128xf32>
    %c0_5 = arith.constant 0 : index
    %c0_6 = arith.constant 0 : index
    %9 = vector.load %arg2[%c0_5, %c0_6] : memref<24x16xf32, #tpu.memory_space<vmem>>, vector<24x16xf32>
    %c0_7 = arith.constant 0 : index
    %c0_8 = arith.constant 0 : index
    %10 = vector.load %arg4[%c0_7, %c0_8] : memref<16x256xf32, #tpu.memory_space<vmem>>, vector<16x256xf32>
    %cst_9 = arith.constant dense<0.000000e+00> : vector<24x256xf32>
    %11 = tpu.matmul %9, %10, %cst_9 {dimension_numbers = #tpu.dot_dimension_numbers<[1], [0], [0], [1], [0, 0, 1, 1], [], []>} : vector<24x16xf32>, vector<16x256xf32>, vector<24x256xf32> -> vector<24x256xf32>
    %12 = vector.extract_strided_slice %11 {offsets = [0, 0], sizes = [24, 128], strides = [1, 1]} : vector<24x256xf32> to vector<24x128xf32>
    %13 = arith.addf %6, %12 : vector<24x128xf32>
    %14 = vector.extract_strided_slice %11 {offsets = [0, 128], sizes = [24, 128], strides = [1, 1]} : vector<24x256xf32> to vector<24x128xf32>
    %15 = arith.addf %7, %14 : vector<24x128xf32>
    %cst_10 = arith.constant 0.000000e+00 : f32
    %16 = vector.broadcast %cst_10 : f32 to vector<24x128xf32>
    %17 = arith.subf %16, %15 : vector<24x128xf32>
    %18 = math.exp %17 : vector<24x128xf32>
    %cst_11 = arith.constant 1.000000e+00 : f32
    %19 = vector.broadcast %cst_11 : f32 to vector<24x128xf32>
    %20 = arith.addf %19, %18 : vector<24x128xf32>
    %21 = tpu.reciprocal %20 {approx = true} : vector<24x128xf32> -> vector<24x128xf32>
    %22 = arith.mulf %13, %21 : vector<24x128xf32>
    %c0_12 = arith.constant 0 : index
    %c0_13 = arith.constant 0 : index
    %23 = vector.load %arg6[%c0_12, %c0_13] : memref<128x128xf32, #tpu.memory_space<vmem>>, vector<128x128xf32>
    %cst_14 = arith.constant dense<0.000000e+00> : vector<24x128xf32>
    %24 = tpu.matmul %22, %23, %cst_14 {dimension_numbers = #tpu.dot_dimension_numbers<[1], [0], [0], [1], [0, 0, 1, 1], [], []>} : vector<24x128xf32>, vector<128x128xf32>, vector<24x128xf32> -> vector<24x128xf32>
    %25 = arith.addf %24, %8 : vector<24x128xf32>
    %c0_15 = arith.constant 0 : index
    %c0_16 = arith.constant 0 : index
    %26 = vector.load %arg7[%c0_15, %c0_16] : memref<24x128xf32, #tpu.memory_space<vmem>>, vector<24x128xf32>
    tpu.vector_store %arg7[%c0_15, %c0_16], %25 {strides = array<i32>} : memref<24x128xf32, #tpu.memory_space<vmem>>, vector<24x128xf32>,
    return
  }
  func.func @transform_0(%arg0: i32) -> (i32, i32) {
    %c0_i32 = arith.constant 0 : i32
    %c0_i32_0 = arith.constant 0 : i32
    return %arg0, %c0_i32 : i32, i32
  }
  func.func @transform_1(%arg0: i32) -> (i32, i32) {
    %c0_i32 = arith.constant 0 : i32
    %c0_i32_0 = arith.constant 0 : i32
    return %arg0, %c0_i32 : i32, i32
  }
  func.func @transform_2(%arg0: i32) -> (i32, i32) {
    %c0_i32 = arith.constant 0 : i32
    %c0_i32_0 = arith.constant 0 : i32
    %c0_i32_1 = arith.constant 0 : i32
    return %c0_i32, %c0_i32_0 : i32, i32
  }
  func.func @transform_3(%arg0: i32) -> (i32, i32) {
    %c0_i32 = arith.constant 0 : i32
    %c0_i32_0 = arith.constant 0 : i32
    %c0_i32_1 = arith.constant 0 : i32
    return %c0_i32, %c0_i32_0 : i32, i32
  }
  func.func @transform_4(%arg0: i32) -> (i32, i32) {
    %c0_i32 = arith.constant 0 : i32
    %c0_i32_0 = arith.constant 0 : i32
    %c0_i32_1 = arith.constant 0 : i32
    return %c0_i32, %c0_i32_0 : i32, i32
  }
  func.func @transform_5(%arg0: i32) -> (i32, i32) {
    %c0_i32 = arith.constant 0 : i32
    %c0_i32_0 = arith.constant 0 : i32
    %c0_i32_1 = arith.constant 0 : i32
    return %c0_i32, %c0_i32_0 : i32, i32
  }
  func.func @transform_6(%arg0: i32) -> (i32, i32) {
    %c0_i32 = arith.constant 0 : i32
    %c0_i32_0 = arith.constant 0 : i32
    return %arg0, %c0_i32 : i32, i32
  }
}

</mosaic_0001>

<bundles_post_ra>
// kernel: tpu_custom_call.1
= control target key start
LH: loop header
LB: loop body
LE: loop exit
PB: predicated region body
PF: predicated region fallthrough
CT: control target
= control target key end

     0   :  { %11 = vsyncpa [#allocation3], 0  ;;  %s942_s0 = inlined_call_operand.hbm [shape: f32[24,32], index: 0, kind: input, shape index: {}]   ;;  %s943_s1 = inlined_call_operand.vmem [shape: f32[24,16], index: 1, kind: input, shape index: {}]   ;;  %s944_s2 = inlined_call_operand.hbm [shape: f32[32,384], index: 2, kind: input, shape index: {}]   ;;  %s945_s3 = inlined_call_operand.vmem [shape: f32[16,256], index: 3, kind: input, shape index: {}]   ;;  %s946_s4 = inlined_call_operand.vmem [shape: f32[1,384], index: 4, kind: input, shape index: {}]   ;;  %s947_s5 = inlined_call_operand.hbm [shape: f32[128,128], index: 5, kind: input, shape index: {}]   ;;  %s948_s6 = inlined_call_operand.hbm [shape: f32[24,128], index: 6, kind: output, shape index: {}]  }
   0x1   :  { %12 = vsyncpa [#allocation6], 0 }
   0x2   :  { %13 = vsyncpa [#allocation4], 0  ;;  %s781_s21 = smov [#allocation5]   ;;  %s687_s25 = scalar_lea.hbm %s944_s2, 1536 }
   0x3   :  { %s33_s22 = sshll.u32 %s781_s21, 4  ;;  %p688_p0 = scmp.ne.s32.totalorder %s944_s2, %s687_s25  ;;  %s34_s22 = int_to_ptr.vmem [resolvable:$true] %s33_s22 }
   0x4   :  { %p691_p1 = scmp.lt.u32.totalorder %s687_s25, %s944_s2 }
   0x6   :  { %p693_p2 = pnand %p691_p1, %p688_p0 }
   0x8   :  { %696 = shalt.err (!%p693_p2)
}
   0x9   :  { %s697_s30 = scalar_lea.vmem %s34_s22, 1536  ;;  %p702_p4 = scmp.lt.s32.totalorder %s34_s22, %s34_s22 }
   0xa   :  { %p698_p3 = scmp.ne.s32.totalorder %s34_s22, %s697_s30  ;;  %p703_p5 = scmp.lt.s32.totalorder %s697_s30, %s697_s30 }
   0xc   :  { %p704_p6 = por %p703_p5, %p702_p4 }
   0xe   :  { %p705_p7 = pnand %p704_p6, %p698_p3 }
  0x10   :  { %708 = shalt.err (!%p705_p7)
}
  0x11   :  { %s782_s7 = smov 384   ;;  %s783_s8 = smov 24  }
  0x12   :  { %39 = dma.hbm_to_vmem [thread:$0]  %s944_s2, 1536, %s34_s22, [#allocation6], %s782_s7, %s782_s7, %s783_s8  }
  0x13   :  { %s784_s11 = smov [#allocation2]   ;;  %s709_s15 = scalar_lea.hbm %s942_s0, 384 }
  0x14   :  { %s19_s12 = sshll.u32 %s784_s11, 4  ;;  %p710_p8 = scmp.ne.s32.totalorder %s942_s0, %s709_s15  ;;  %s20_s12 = int_to_ptr.vmem [resolvable:$true] %s19_s12 }
  0x15   :  { %p713_p9 = scmp.lt.u32.totalorder %s709_s15, %s942_s0 }
  0x17   :  { %p715_p10 = pnand %p713_p9, %p710_p8 }
  0x19   :  { %718 = shalt.err (!%p715_p10)
}
  0x1a   :  { %s719_s20 = scalar_lea.vmem %s20_s12, 384  ;;  %p724_p12 = scmp.lt.s32.totalorder %s20_s12, %s20_s12 }
  0x1b   :  { %p720_p11 = scmp.ne.s32.totalorder %s20_s12, %s719_s20  ;;  %p725_p13 = scmp.lt.s32.totalorder %s719_s20, %s719_s20 }
  0x1d   :  { %p726_p0 = por %p725_p13, %p724_p12 }
  0x1f   :  { %p727_p1 = pnand %p726_p0, %p720_p11 }
  0x21   :  { %730 = shalt.err (!%p727_p1)
}
  0x22   :  { %s785_s2 = smov 128   ;;  %s786_s21 = smov 8  }
  0x23   :  { %25 = dma.hbm_to_vmem [thread:$0]  %s942_s0, 384, %s20_s12, [#allocation3], %s785_s2, %s785_s2, %s786_s21  }
  0x24   :  { %s787_s24 = smov [#allocation7]   ;;  %s731_s28 = scalar_lea.hbm %s947_s5, 2048 }
  0x25   :  { %s49_s25 = sshll.u32 %s787_s24, 4  ;;  %p732_p2 = scmp.ne.s32.totalorder %s947_s5, %s731_s28  ;;  %s50_s25 = int_to_ptr.vmem [resolvable:$true] %s49_s25 }
  0x26   :  { %p735_p3 = scmp.lt.u32.totalorder %s731_s28, %s947_s5 }
  0x28   :  { %p737_p4 = pnand %p735_p3, %p732_p2 }
  0x2a   :  { %740 = shalt.err (!%p737_p4)
}
  0x2b   :  { %s741_s9 = scalar_lea.vmem %s50_s25, 2048  ;;  %p746_p6 = scmp.lt.s32.totalorder %s50_s25, %s50_s25 }
  0x2c   :  { %p742_p5 = scmp.ne.s32.totalorder %s50_s25, %s741_s9  ;;  %p747_p7 = scmp.lt.s32.totalorder %s741_s9, %s741_s9 }
  0x2e   :  { %p748_p8 = por %p747_p7, %p746_p6 }
  0x30   :  { %p749_p9 = pnand %p748_p8, %p742_p5 }
  0x32   :  { %752 = shalt.err (!%p749_p9)
}
  0x33   :  { %55 = dma.hbm_to_vmem [thread:$0]  %s947_s5, 2048, %s50_s25, [#allocation6], %s785_s2, %s785_s2, %s786_s21  }
  0x34   :  { %775 = dma.done.wait [#allocation3], 384  }
  0x35   :  { %776 = vsyncadd [#allocation3], 4294966912 }
  0x36   :  { %777 = dma.done.wait [#allocation6], 3584  }
  0x37   :  { %778 = vsyncadd [#allocation6], 4294963712  ;;  %v788_v0 = vmov 0.0   ;;  %v789_v1 = vmov 0.0|0.0   ;;  %vm790_vm0 = vmmov 0   ;;  %v69_v2 = vld [vmem:[#allocation5 + $0x8] sm:$0xff]  ;;  %v82_v56 = vlaneseq }
  0x38   :  { %171 = vmatprep.mubr.f32.mxu0 %v788_v0  ;;  %622 = vmatprep.subr.bf16.mxu1 %v789_v1  ;;  %v72_v3 = vld [vmem:[#allocation5 + $0x20] sm:$0xff]  ;;  %v71_v6 = vld [vmem:[#allocation5 + $0x18] sm:$0xff]  ;;  %v78_v8 = vld [vmem:[#allocation5 + $0x50] sm:$0xff]  ;;  %vm97_vm1 = vcmask 261120   ;;  %vm277_vm2 = vcmask 130048  }
  0x39   :  { %595 = vmatprep.mubr.msk.f32.mxu1 %vm790_vm0, %v788_v0  ;;  %v68_v4 = vld [vmem:[#allocation5] sm:$0xff]  ;;  %v604_v5 = vpack.c.bf16 %v72_v3, %v69_v2  ;;  %v75_v7 = vld [vmem:[#allocation5 + $0x38] sm:$0xff]  ;;  %v74_v11 = vld [vmem:[#allocation5 + $0x30] sm:$0xff]  ;;  %v83_v59 = vshrl.u32 %v82_v56, 7 }
  0x3a   :  { %v606_v9 = vpack.c.bf16 %v71_v6, %v68_v4  ;;  %v608_v10 = vpack.c.bf16 %v78_v8, %v75_v7  ;;  %v77_v12 = vld [vmem:[#allocation5 + $0x48] sm:$0xff]  ;;  %v70_v14 = vld [vmem:[#allocation5 + $0x10] sm:$0xff]  ;;  %v76_v18 = vld [vmem:[#allocation5 + $0x40] sm:$0xff] }
  0x3b   :  { %605 = vmatprep.subr.bf16.mxu0 %v604_v5  ;;  %v610_v13 = vpack.c.bf16 %v77_v12, %v74_v11  ;;  %v73_v15 = vld [vmem:[#allocation5 + $0x28] sm:$0xff]  ;;  %v79_v19 = vld [vmem:[#allocation5 + $0x58] sm:$0xff]  ;;  %v274_v20 = vld [vmem:[%s945_s3 + $0x8] sm:$0xff]  ;;  %v88_v62 = vsub.s32 1, %v83_v59 }
  0x3c   :  { %607 = vmatpush1.bf16.msra.mxu0 %v606_v9  ;;  %v65_v16 = vld [vmem:[#allocation2] sm:$0xff]  ;;  %v613_v17 = vpack.c.bf16 %v73_v15, %v70_v14  ;;  %v276_v21 = vld [vmem:[%s945_s3 + $0x18] sm:$0xff]  ;;  %v66_v22 = vld [vmem:[#allocation2 + $0x8] sm:$0xff]  ;;  %v616_v23 = vpack.c.bf16 %v79_v19, %v76_v18 }
  0x3d   :  { %609 = vmatprep.subr.bf16.mxu0 %v608_v10  ;;  %v618_v24 = vpack.c.bf16 %v276_v21, %v274_v20  ;;  %v67_v25 = vld [vmem:[#allocation2 + $0x10] sm:$0xff]  ;;  %v273_v26 = vld [vmem:[%s945_s3] sm:$0xff]  ;;  %v271_v30 = vld [vmem:[%s943_s1 + $0x8] sm:$0xff] }
  0x3e   :  { %v275_v27 = vld [vmem:[%s945_s3 + $0x10] sm:$0xff]  ;;  %v270_v29 = vld [vmem:[%s943_s1] sm:$0xff]  ;;  %v394_v32 = vld [vmem:[#allocation7] sm:$0xff] }
  0x3f   :  { %v620_v28 = vpack.c.bf16 %v275_v27, %v273_v26  ;;  %v272_v31 = vld [vmem:[%s943_s1 + $0x10] sm:$0xff]  ;;  %v395_v33 = vld [vmem:[#allocation7 + $0x8] sm:$0xff]  ;;  %v396_v35 = vld [vmem:[#allocation7 + $0x10] sm:$0xff] }
  0x40   :  { %611 = vmatpush1.bf16.msra.mxu0 %v610_v13  ;;  %v623_v34 = vpack.c.bf16 %v395_v33, %v394_v32  ;;  %v397_v36 = vld [vmem:[#allocation7 + $0x18] sm:$0xff]  ;;  %v398_v38 = vld [vmem:[#allocation7 + $0x20] sm:$0xff]  ;;  %v399_v39 = vld [vmem:[#allocation7 + $0x28] sm:$0xff] }
  0x41   :  { %612 = vmatprep.subr.bf16.mxu0 %v789_v1  ;;  %v626_v37 = vpack.c.bf16 %v397_v36, %v396_v35  ;;  %v629_v40 = vpack.c.bf16 %v399_v39, %v398_v38  ;;  %v400_v41 = vld [vmem:[#allocation7 + $0x30] sm:$0xff]  ;;  %v401_v42 = vld [vmem:[#allocation7 + $0x38] sm:$0xff]  ;;  %v402_v44 = vld [vmem:[#allocation7 + $0x40] sm:$0xff]  ;;  %v92_v36 = vsub.s32 2, %v83_v59 }
  0x42   :  { %624 = vmatpush3.bf16.msra.mxu1 %v623_v34  ;;  %v632_v43 = vpack.c.bf16 %v401_v42, %v400_v41  ;;  %v403_v45 = vld [vmem:[#allocation7 + $0x48] sm:$0xff]  ;;  %v404_v47 = vld [vmem:[#allocation7 + $0x50] sm:$0xff]  ;;  %v405_v48 = vld [vmem:[#allocation7 + $0x58] sm:$0xff] }
  0x43   :  { %511 = vmatmul.mubr.msk.f32.vlgmr.msra.gmra.mrb[0].mxu0 %vm97_vm1, %v65_v16  ;;  %625 = vmatprep.subr.bf16.mxu1 %v789_v1  ;;  %v635_v46 = vpack.c.bf16 %v403_v45, %v402_v44  ;;  %v638_v49 = vpack.c.bf16 %v405_v48, %v404_v47  ;;  %v406_v50 = vld [vmem:[#allocation7 + $0x60] sm:$0xff]  ;;  %v407_v51 = vld [vmem:[#allocation7 + $0x68] sm:$0xff]  ;;  %v408_v53 = vld [vmem:[#allocation7 + $0x70] sm:$0xff] }
  0x44   :  { %614 = vmatpush3.bf16.msra.mxu0 %v613_v17  ;;  %177 = vmatprep.mubr.f32.mxu0 %v788_v0  ;;  %v641_v52 = vpack.c.bf16 %v407_v51, %v406_v50  ;;  %v409_v54 = vld [vmem:[#allocation7 + $0x78] sm:$0xff]  ;;  %v80_v2 = vld [vmem:[%s946_s4] sm:$0x7]  ;;  %s791_s4 = smov [#allocation8]  }
  0x45   :  { %615 = vmatprep.subr.bf16.mxu0 %v789_v1  ;;  %v644_v55 = vpack.c.bf16 %v409_v54, %v408_v53  ;;  %v89_v4 = vrot.slane %v80_v2, %v88_v62  ;;  %s498_s25 = sshll.u32 %s791_s4, 4  ;;  %s499_s25 = int_to_ptr.vmem [resolvable:$true] %s498_s25 }
  0x46   :  { %627 = vmatpush3.bf16.msra.mxu1 %v626_v37  ;;  %v93_v37 = vrot.slane %v80_v2, %v92_v36  ;;  %s753_s26 = scalar_lea.vmem %s499_s25, 384  ;;  %p758_p11 = scmp.lt.s32.totalorder %s499_s25, %s499_s25 }
  0x47   :  { %512 = vmatmul.mubr.msk.f32.gmra.mrb[2].mxu0 %vm97_vm1, %v66_v22  ;;  %628 = vmatprep.subr.bf16.mxu1 %v789_v1  ;;  %p754_p10 = scmp.ne.s32.totalorder %s499_s25, %s753_s26  ;;  %p759_p12 = scmp.lt.s32.totalorder %s753_s26, %s753_s26 }
  0x48   :  { %183 = vmatprep.mubr.f32.mxu0 %v788_v0  ;;  %617 = vmatpush3.bf16.msra.mxu0 %v616_v23 }
  0x49   :  { %619 = vmatprep.subr.bf16.mxu0 %v618_v24  ;;  %p760_p13 = por %p759_p12, %p758_p11 }
  0x4a   :  { %630 = vmatpush3.bf16.msra.mxu1 %v629_v40 }
  0x4b   :  { %513 = vmatmul.mubr.msk.f32.gmra.mrb[4].mxu0 %vm97_vm1, %v67_v25  ;;  %631 = vmatprep.subr.bf16.mxu1 %v789_v1  ;;  %p761_p0 = pnand %p760_p13, %p754_p10 }
  0x4c   :  { %554 = vmatprep.mubr.msk.f32.mxu0 %vm790_vm0, %v788_v0 }
  0x4e   :  { %633 = vmatpush3.bf16.msra.mxu1 %v632_v43 }
  0x4f   :  { %555 = vmatmul.mubr.msk.f32.vlgmr.msra.gmra.mrb[6].mxu0 %vm97_vm1, %v65_v16  ;;  %634 = vmatprep.subr.bf16.mxu1 %v789_v1 }
  0x50   :  { %621 = vmatpush1.bf16.msra.mxu0 %v620_v28  ;;  %557 = vmatprep.mubr.msk.f32.mxu0 %vm790_vm0, %v788_v0 }
  0x52   :  { %636 = vmatpush3.bf16.msra.mxu1 %v635_v46 }
  0x53   :  { %558 = vmatmul.mubr.msk.f32.gmra.mrb[8].mxu0 %vm97_vm1, %v66_v22  ;;  %637 = vmatprep.subr.bf16.mxu1 %v789_v1  ;;  %v84_v22 = vsub.s32 0, %v83_v59 }
  0x54   :  { %560 = vmatprep.mubr.msk.f32.mxu0 %vm790_vm0, %v788_v0 }
  0x56   :  { %639 = vmatpush3.bf16.msra.mxu1 %v638_v49 }
  0x57   :  { %561 = vmatmul.mubr.msk.f32.gmra.mrb[10].mxu0 %vm97_vm1, %v67_v25  ;;  %640 = vmatprep.subr.bf16.mxu1 %v789_v1  ;;  %v85_v25 = vrot.slane %v80_v2, %v84_v22 }
  0x58   :  { %351 = vmatprep.mubr.f32.mxu0 %v788_v0 }
  0x5a   :  { %642 = vmatpush3.bf16.msra.mxu1 %v641_v52 }
  0x5b   :  { %517 = vmatmul.mubr.msk.f32.vlgmr.msra.gmra.mrb[0].mxu0 %vm277_vm2, %v270_v29  ;;  %643 = vmatprep.subr.bf16.mxu1 %v789_v1 }
  0x5c   :  { %357 = vmatprep.mubr.f32.mxu0 %v788_v0 }
  0x5e   :  { %645 = vmatpush3.bf16.msra.mxu1 %v644_v55 }
  0x5f   :  { %518 = vmatmul.mubr.msk.f32.gmra.mrb[2].mxu0 %vm277_vm2, %v271_v30 }
  0x60   :  { %363 = vmatprep.mubr.f32.mxu0 %v788_v0 }
  0x63   :  { %519 = vmatmul.mubr.msk.f32.gmra.mrb[4].mxu0 %vm277_vm2, %v272_v31 }
 0x122   :  { %v256_v57 = vpop.f32.mrb[6].mxu0 }
 0x123   :  { %v556_v58 = vpop.f32.mrb[7].mxu0  ;;  %v257_v38 = vadd.f32 %v256_v57, %v93_v37 }
 0x126   :  { %v261_v60 = vpop.f32.mrb[8].mxu0 }
 0x127   :  { %v559_v61 = vpop.f32.mrb[9].mxu0  ;;  %v262_v42 = vadd.f32 %v261_v60, %v93_v37 }
 0x12a   :  { %v266_v63 = vpop.f32.mrb[10].mxu0 }
 0x12b   :  { %v562_v3 = vpop.f32.mrb[11].mxu0  ;;  %v267_v46 = vadd.f32 %v266_v63, %v93_v37 }
 0x12e   :  { %v353_v5 = vpop.f32.mrb[0].mxu0 }
 0x12f   :  { %v355_v1 = vpop.f32.mrb[1].mxu0  ;;  %v646_v27 = vadd.f32 %v353_v5, %v85_v25 }
 0x130   :  { %v647_v6 = vadd.f32 %v355_v1, %v89_v4 }
 0x132   :  { %v376_v7 = vsub.f32 0.0, %v647_v6  ;;  %v359_v8 = vpop.f32.mrb[2].mxu0 }
 0x133   :  { %v361_v9 = vpop.f32.mrb[3].mxu0  ;;  %v648_v30 = vadd.f32 %v359_v8, %v85_v25 }
 0x134   :  { %v379_v10 = vmul.f32 1.442695, %v376_v7  ;;  %v649_v11 = vadd.f32 %v361_v9, %v89_v4 }
 0x136   :  { %675 = vpow2.f32 %v379_v10  ;;  %v377_v12 = vsub.f32 0.0, %v649_v11  ;;  %v365_v13 = vpop.f32.mrb[4].mxu0 }
 0x137   :  { %v367_v14 = vpop.f32.mrb[5].mxu0  ;;  %v650_v33 = vadd.f32 %v365_v13, %v85_v25 }
 0x138   :  { %v381_v15 = vmul.f32 1.442695, %v377_v12  ;;  %v651_v16 = vadd.f32 %v367_v14, %v89_v4 }
 0x13a   :  { %677 = vpow2.f32 %v381_v15  ;;  %v378_v17 = vsub.f32 0.0, %v651_v16 }
 0x13c   :  { %v383_v18 = vmul.f32 1.442695, %v378_v17 }
 0x13e   :  { %679 = vpow2.f32 %v383_v18 }
 0x140   :  { %v676_v19 = vpop.eup %675 }
 0x141   :  { %v385_v20 = vadd.f32 1.0, %v676_v19 }
 0x143   :  { %681 = vrcp.f32 %v385_v20 }
 0x144   :  { %v678_v21 = vpop.eup %677 }
 0x145   :  { %v386_v23 = vadd.f32 1.0, %v678_v21 }
 0x147   :  { %683 = vrcp.f32 %v386_v23 }
 0x148   :  { %v680_v24 = vpop.eup %679 }
 0x149   :  { %v387_v26 = vadd.f32 1.0, %v680_v24 }
 0x14b   :  { %685 = vrcp.f32 %v387_v26 }
 0x14d   :  { %v682_v28 = vpop.eup %681 }
 0x14e   :  { %v391_v29 = vmul.f32 %v682_v28, %v646_v27 }
 0x150   :  { %596 = vmatmul.mubr.f32.vlgmr.msra.gmra.mrb[0].mxu1 %v391_v29 }
 0x151   :  { %v684_v31 = vpop.eup %683  ;;  %598 = vmatprep.mubr.msk.f32.mxu1 %vm790_vm0, %v788_v0 }
 0x152   :  { %v392_v32 = vmul.f32 %v684_v31, %v648_v30 }
 0x154   :  { %599 = vmatmul.mubr.f32.gmra.mrb[2].mxu1 %v392_v32 }
 0x155   :  { %v686_v34 = vpop.eup %685  ;;  %601 = vmatprep.mubr.msk.f32.mxu1 %vm790_vm0, %v788_v0 }
 0x156   :  { %v393_v35 = vmul.f32 %v686_v34, %v650_v33 }
 0x158   :  { %602 = vmatmul.mubr.f32.gmra.mrb[4].mxu1 %v393_v35 }
 0x223   :  { %v476_v39 = vpop.f32.mrb[0].mxu1 }
 0x224   :  { %v477_v40 = vadd.f32 %v476_v39, %v257_v38  ;;  %v597_v41 = vpop.f32.mrb[1].mxu1 }
 0x226   :  { %490 = vst [vmem:[#allocation8] sm:$0xff] %v477_v40 }
 0x227   :  { %v481_v43 = vpop.f32.mrb[2].mxu1 }
 0x228   :  { %v482_v44 = vadd.f32 %v481_v43, %v262_v42  ;;  %v600_v45 = vpop.f32.mrb[3].mxu1 }
 0x22a   :  { %491 = vst [vmem:[#allocation8 + $0x8] sm:$0xff] %v482_v44 }
 0x22b   :  { %v486_v47 = vpop.f32.mrb[4].mxu1 }
 0x22c   :  { %v487_v48 = vadd.f32 %v486_v47, %v267_v46  ;;  %v603_v0 = vpop.f32.mrb[5].mxu1 }
 0x22e   :  { %492 = vst [vmem:[#allocation8 + $0x10] sm:$0xff] %v487_v48 }
 0x22f   :  { %764 = shalt.err (!%p761_p0)
}
 0x230   :  { %s765_s29 = scalar_lea.hbm %s948_s6, 384 }
 0x231   :  { %p766_p1 = scmp.ne.s32.totalorder %s948_s6, %s765_s29  ;;  %p769_p2 = scmp.lt.u32.totalorder %s765_s29, %s948_s6 }
 0x233   :  { %p771_p3 = pnand %p769_p2, %p766_p1 }
 0x235   :  { %774 = shalt.err (!%p771_p3)
}
 0x236   :  { %504 = dma.vmem_to_hbm [thread:$0]  %s499_s25, 384, %s948_s6, [#allocation4], %s785_s2, %s785_s2, %s786_s21  }
 0x237   :  { %779 = dma.done.wait [#allocation4], 384  }
 0x238   :  { %780 = vsyncadd [#allocation4], 4294966912 }
 0x239   :  { %508 = vsyncpa [#allocation3], 1 }
 0x23a   :  { %509 = vsyncpa [#allocation6], 1 }
 0x23b   :  { %510 = vsyncpa [#allocation4], 1 }

</bundles_post_ra>
